<compile_context>
chip_gen: v6e
topology: v6e:2x2x1
jax: 0.10.0
libtpu: 0.0.40
codegen_flags: <defaults>
</compile_context>

<pallas_src>
import functools
import math

import jax
import jax.numpy as jnp
from jax import lax
from jax.experimental import pallas as pl
from jax.experimental.pallas import tpu as pltpu


# Explicit scoped-VMEM budget: above the 16 MiB (v5e) / 32 MiB (v6e, v7x)
# defaults, comfortably below v7x's 64 MiB physical VMEM.
_VMEM_LIMIT_BYTES = 48 * 1024 * 1024
# Conservative budget for choosing the fully-fused per-batch kernel.
_FUSED_VMEM_BUDGET = 20 * 1024 * 1024

# Tile targets (f32) for the fallback tiled matmuls.  With double-buffered
# inputs this is ~3 MiB of VMEM, safe on v5e/v6e/v7x.  Lane tiles are
# 128-aligned so they are valid on both 128-wide (v5e) and 256-wide MXUs.
_TM_TARGET = 256   # sublane-ish (rows of X / output)
_TN_TARGET = 256   # lane (output columns)
_TK_TARGET = 512   # lane (contraction)


def _pick_tile(dim, target, align):
    """Largest tile <= target that is a multiple of `align` and divides `dim`.

    Falls back to the full dimension (always a legal block shape)."""
    if dim <= target:
        return dim
    t = (target // align) * align
    while t >= align:
        if dim % t == 0:
            return t
        t -= align
    return dim


def _fused_fits_vmem(S, E, head, itemsize):
    """Rough per-grid-step VMEM estimate for the fully-fused kernel."""
    d_k = max(E // head, 1)
    weights = 4 * E * E * itemsize + 8 * E * 4               # W_qkv, W_out, biases
    io = 2 * 2 * S * E * itemsize + 2 * S * E * 4            # x (dbl-buf) + out (dbl-buf)
    interm = 4 * S * E * 4 + 3 * S * S * 4 + 2 * S * d_k * 4  # q/k/v/attn + scores
    return (weights + io + interm) <= _FUSED_VMEM_BUDGET


# ---------------------------------------------------------------------------
# Fully-fused self-attention forward (one grid step = one batch element).
#   o[b] = softmax_heads((x W_q^T + b_q)(x W_k^T + b_k)^T) (x W_v^T + b_v) W_o^T + b_o
# (scale 1/sqrt(d_k) is pre-folded into W_q / b_q.)
# ---------------------------------------------------------------------------
def _fused_mha_kernel(x_ref, wqkv_ref, bqkv_ref, wout_ref, bout_ref, o_ref,
                      attn_ref, *, head, d_k, approx_recip, matmul_dtype):
    x = x_ref[0]                                              # [S, E]

    def proj(p):
        y = jnp.dot(x, wqkv_ref[p], preferred_element_type=jnp.float32)
        return (y + bqkv_ref[p]).astype(matmul_dtype)         # [S, E]

    q, k, v = proj(0), proj(1), proj(2)

    for h in range(head):                                     # static unroll
        lo, hi = h * d_k, (h + 1) * d_k
        # Q @ K^T without materializing a transpose of K.
        s = lax.dot_general(q[:, lo:hi], k[:, lo:hi],
                            dimension_numbers=(((1,), (1,)), ((), ())),
                            preferred_element_type=jnp.float32)    # [S, S]
        m = jnp.max(s, axis=-1, keepdims=True)
        p = jnp.exp(s - m)
        denom = jnp.sum(p, axis=-1, keepdims=True)
        p = p * pl.reciprocal(denom, approx=approx_recip)
        attn_ref[:, lo:hi] = jnp.dot(p.astype(matmul_dtype), v[:, lo:hi],
                                     preferred_element_type=jnp.float32)

    attn = attn_ref[...].astype(matmul_dtype)                 # [S, E]
    out = jnp.dot(attn, wout_ref[...],
                  preferred_element_type=jnp.float32) + bout_ref[...]
    o_ref[0] = out.astype(o_ref.dtype)


def fused_mha_forward(x, w_qkv_t, b_qkv, w_out_t, b_out2d, *, head,
                      approx_recip=False, matmul_dtype=jnp.float32,
                      out_dtype=jnp.float32):
    """x: [B, S, E]; w_qkv_t: [3, E, E]; b_qkv: [3, 1, E]; w_out_t: [E, E];
    b_out2d: [1, E].  Returns [B, S, E]."""
    B, S, E = x.shape
    d_k = E // head
    kernel = functools.partial(
        _fused_mha_kernel, head=head, d_k=d_k,
        approx_recip=approx_recip, matmul_dtype=matmul_dtype)
    return pl.pallas_call(
        kernel,
        out_shape=jax.ShapeDtypeStruct((B, S, E), out_dtype),
        grid_spec=pltpu.PrefetchScalarGridSpec(
            num_scalar_prefetch=0,
            grid=(B,),
            in_specs=[
                pl.BlockSpec((1, S, E), lambda b: (b, 0, 0)),   # x
                pl.BlockSpec((3, E, E), lambda b: (0, 0, 0)),   # W_qkv (resident)
                pl.BlockSpec((3, 1, E), lambda b: (0, 0, 0)),   # b_qkv
                pl.BlockSpec((E, E), lambda b: (0, 0)),         # W_out (resident)
                pl.BlockSpec((1, E), lambda b: (0, 0)),         # b_out
            ],
            out_specs=pl.BlockSpec((1, S, E), lambda b: (b, 0, 0)),
            scratch_shapes=[pltpu.VMEM((S, E), jnp.float32)],   # attn accumulator
        ),
        compiler_params=pltpu.CompilerParams(
            dimension_semantics=("parallel",),
            vmem_limit_bytes=_VMEM_LIMIT_BYTES,
        ),
    )(x, w_qkv_t, b_qkv, w_out_t, b_out2d)


# ---------------------------------------------------------------------------
# Tiled linear kernel:  out = X @ W_t + b   (fallback path)
# ---------------------------------------------------------------------------
def _linear_kernel(x_ref, w_ref, b_ref, o_ref, acc_ref):
    # grid = (i, j, k); x: (tm, tk), w: (tk, tn), b: (1, tn), o: (tm, tn)
    @pl.when(pl.program_id(2) == 0)
    def _init():
        acc_ref[...] = jnp.zeros_like(acc_ref)

    acc_ref[...] += jnp.dot(x_ref[...], w_ref[...],
                            preferred_element_type=jnp.float32)

    @pl.when(pl.program_id(2) == pl.num_programs(2) - 1)
    def _store():
        # Bias added once, in the epilogue only.
        o_ref[...] = (acc_ref[...] + b_ref[...]).astype(o_ref.dtype)


def linear(x2d, w_t, b, *, out_dtype=None):
    """x2d: [M, K], w_t: [K, N] (already transposed), b: [N] or [1, N]."""
    M, K = x2d.shape
    _, N = w_t.shape
    out_dtype = out_dtype if out_dtype is not None else x2d.dtype
    tm = _pick_tile(M, _TM_TARGET, 8)
    tn = _pick_tile(N, _TN_TARGET, 128)
    tk = _pick_tile(K, _TK_TARGET, 128)
    return pl.pallas_call(
        _linear_kernel,
        out_shape=jax.ShapeDtypeStruct((M, N), out_dtype),
        grid_spec=pltpu.PrefetchScalarGridSpec(
            num_scalar_prefetch=0,
            grid=(M // tm, N // tn, K // tk),
            in_specs=[
                pl.BlockSpec((tm, tk), lambda i, j, k: (i, k)),
                pl.BlockSpec((tk, tn), lambda i, j, k: (k, j)),
                pl.BlockSpec((1, tn), lambda i, j, k: (0, j)),
            ],
            out_specs=pl.BlockSpec((tm, tn), lambda i, j, k: (i, j)),
            scratch_shapes=[pltpu.VMEM((tm, tn), jnp.float32)],
        ),
        compiler_params=pltpu.CompilerParams(
            dimension_semantics=("parallel", "parallel", "arbitrary"),
            vmem_limit_bytes=_VMEM_LIMIT_BYTES,
        ),
    )(x2d, w_t, b.reshape(1, N))


# ---------------------------------------------------------------------------
# Fused Q/K/V projection:  out[p] = X @ Wt[p] + b[p]   (fallback path)
# Output laid out as [3, M, E] so attention can slice heads without any
# HBM transpose.
# ---------------------------------------------------------------------------
def _qkv_kernel(x_ref, w_ref, b_ref, o_ref, acc_ref):
    @pl.when(pl.program_id(3) == 0)
    def _init():
        acc_ref[...] = jnp.zeros_like(acc_ref)

    acc_ref[...] += jnp.dot(x_ref[...], w_ref[0],
                            preferred_element_type=jnp.float32)

    @pl.when(pl.program_id(3) == pl.num_programs(3) - 1)
    def _store():
        o_ref[0] = (acc_ref[...] + b_ref[0]).astype(o_ref.dtype)


def qkv_projection(x2d, w_qkv_t, b_qkv, *, out_dtype=None):
    """x2d: [M, E], w_qkv_t: [3, E, E], b_qkv: [3, 1, E] -> [3, M, E]."""
    M, K = x2d.shape
    _, _, N = w_qkv_t.shape
    out_dtype = out_dtype if out_dtype is not None else x2d.dtype
    tm = _pick_tile(M, _TM_TARGET, 8)
    tn = _pick_tile(N, _TN_TARGET, 128)
    tk = _pick_tile(K, _TK_TARGET, 128)
    return pl.pallas_call(
        _qkv_kernel,
        out_shape=jax.ShapeDtypeStruct((3, M, N), out_dtype),
        grid_spec=pltpu.PrefetchScalarGridSpec(
            num_scalar_prefetch=0,
            grid=(3, M // tm, N // tn, K // tk),
            in_specs=[
                pl.BlockSpec((tm, tk), lambda p, i, j, k: (i, k)),
                pl.BlockSpec((1, tk, tn), lambda p, i, j, k: (p, k, j)),
                pl.BlockSpec((1, 1, tn), lambda p, i, j, k: (p, 0, j)),
            ],
            out_specs=pl.BlockSpec((1, tm, tn), lambda p, i, j, k: (p, i, j)),
            scratch_shapes=[pltpu.VMEM((tm, tn), jnp.float32)],
        ),
        compiler_params=pltpu.CompilerParams(
            dimension_semantics=("parallel", "parallel", "parallel", "arbitrary"),
            vmem_limit_bytes=_VMEM_LIMIT_BYTES,
        ),
    )(x2d, w_qkv_t, b_qkv)


# ---------------------------------------------------------------------------
# Per-batch multi-head attention (fallback path).  1/sqrt(d_k) is already
# folded into the Q projection weights, so no scaling here.
# ---------------------------------------------------------------------------
def _mha_attention_kernel(q_ref, k_ref, v_ref, o_ref, *,
                          head, d_k, approx_recip):
    q_all = q_ref[0, 0]                                   # [S, E]
    k_all = k_ref[0, 0]                                   # [S, E]
    v_all = v_ref[0, 0]                                   # [S, E]

    for h in range(head):                                 # static unroll
        lo, hi = h * d_k, (h + 1) * d_k
        q = q_all[:, lo:hi]                               # [S, d_k]
        k = k_all[:, lo:hi]                               # [S, d_k]
        v = v_all[:, lo:hi]                               # [S, d_k]
        s = lax.dot_general(q, k,
                            dimension_numbers=(((1,), (1,)), ((), ())),
                            preferred_element_type=jnp.float32)   # [S, S]
        m = jnp.max(s, axis=-1, keepdims=True)
        p = jnp.exp(s - m)
        denom = jnp.sum(p, axis=-1, keepdims=True)
        p = p * pl.reciprocal(denom, approx=approx_recip)
        out = jnp.dot(p.astype(v.dtype), v,
                      preferred_element_type=jnp.float32)         # [S, d_k]
        o_ref[0, :, lo:hi] = out.astype(o_ref.dtype)


def multi_head_attention(qkv, *, head, approx_recip=False, out_dtype=None):
    """qkv: [3, B, S, E] -> attention output [B, S, E]."""
    _, B, S, E = qkv.shape
    d_k = E // head
    out_dtype = out_dtype if out_dtype is not None else qkv.dtype
    kernel = functools.partial(
        _mha_attention_kernel, head=head, d_k=d_k, approx_recip=approx_recip)
    return pl.pallas_call(
        kernel,
        out_shape=jax.ShapeDtypeStruct((B, S, E), out_dtype),
        grid_spec=pltpu.PrefetchScalarGridSpec(
            num_scalar_prefetch=0,
            grid=(B,),
            in_specs=[
                pl.BlockSpec((1, 1, S, E), lambda b: (0, b, 0, 0)),  # Q slab
                pl.BlockSpec((1, 1, S, E), lambda b: (1, b, 0, 0)),  # K slab
                pl.BlockSpec((1, 1, S, E), lambda b: (2, b, 0, 0)),  # V slab
            ],
            out_specs=pl.BlockSpec((1, S, E), lambda b: (b, 0, 0)),
        ),
        compiler_params=pltpu.CompilerParams(
            dimension_semantics=("parallel",),
            vmem_limit_bytes=_VMEM_LIMIT_BYTES,
        ),
    )(qkv, qkv, qkv)


# ---------------------------------------------------------------------------
# Module wrapper
# ---------------------------------------------------------------------------
class MultiHeadAttentionPallas:
    def __init__(self, head, embedding_dim, key, dropout=0.1,
                 matmul_dtype=jnp.float32):
        assert embedding_dim % head == 0
        self.head = head
        self.embedding_dim = embedding_dim
        self.d_k = embedding_dim // head
        self.matmul_dtype = jnp.dtype(matmul_dtype)
        # approx reciprocal only in the bf16 "perf" configuration.
        self.approx_recip = self.matmul_dtype == jnp.dtype(jnp.bfloat16)
        # TODO(synk): dropout is eval-mode identity.
        self.dropout_p = dropout

        # 4 linear layers (q, k, v, out), PyTorch-style uniform init, stored
        # torch-style as W[out, in].
        bound = 1.0 / math.sqrt(embedding_dim)
        keys = jax.random.split(key, 8)
        self.weights, self.biases = [], []
        for i in range(4):
            w = jax.random.uniform(keys[2 * i],
                                   (embedding_dim, embedding_dim),
                                   minval=-bound, maxval=bound,
                                   dtype=jnp.float32)
            b = jax.random.uniform(keys[2 * i + 1], (embedding_dim,),
                                   minval=-bound, maxval=bound,
                                   dtype=jnp.float32)
            self.weights.append(w)
            self.biases.append(b)

        # Pre-transposed / stacked kernel parameters.  1/sqrt(d_k) is folded
        # into the Q projection so the attention kernels never rescale.
        E = embedding_dim
        scale = 1.0 / math.sqrt(self.d_k)
        self.w_qkv_t = jnp.stack([
            (self.weights[0] * scale).T,
            self.weights[1].T,
            self.weights[2].T,
        ]).astype(self.matmul_dtype)                                  # [3,E,E]
        self.b_qkv = jnp.stack([
            (self.biases[0] * scale).reshape(1, E),
            self.biases[1].reshape(1, E),
            self.biases[2].reshape(1, E),
        ])                                                            # [3,1,E] f32
        self.w_out_t = self.weights[3].T.astype(self.matmul_dtype)    # [E,E]
        self.b_out = self.biases[3]                                   # [E]  f32
        self.b_out2d = self.biases[3].reshape(1, E)                   # [1,E] f32

    def __call__(self, query, key, value, mask=None):
        # query/key/value: [B, S, E]
        if mask is not None:
            # TODO(synk): mask support (scores.masked_fill(mask==0, -1e9)).
            raise NotImplementedError("mask path not implemented")
        B, S, E = query.shape
        mdt = self.matmul_dtype
        is_self = (query is key) and (key is value)

        if is_self and _fused_fits_vmem(S, E, self.head, mdt.itemsize):
            # Single fused kernel: no intermediate HBM round-trips.
            return fused_mha_forward(
                query.astype(mdt), self.w_qkv_t, self.b_qkv,
                self.w_out_t, self.b_out2d,
                head=self.head, approx_recip=self.approx_recip,
                matmul_dtype=mdt, out_dtype=jnp.float32)

        if is_self:
            # Self-attention, large shapes: fused Q/K/V projection slab.
            x2d = query.reshape(B * S, E).astype(mdt)
            qkv = qkv_projection(x2d, self.w_qkv_t, self.b_qkv, out_dtype=mdt)
            qkv = qkv.reshape(3, B, S, E)                 # metadata-only
        else:
            # Cross-attention fallback: three separate tiled projections.
            projs = []
            for idx, x in enumerate((query, key, value)):
                Bx, Sx, _ = x.shape
                y = linear(x.reshape(Bx * Sx, E).astype(mdt),
                           self.w_qkv_t[idx], self.b_qkv[idx], out_dtype=mdt)
                projs.append(y.reshape(Bx, Sx, E))
            qkv = jnp.stack(projs)                        # [3, B, S, E]

        attn = multi_head_attention(qkv, head=self.head,
                                    approx_recip=self.approx_recip,
                                    out_dtype=mdt)        # [B, S, E]
        out = linear(attn.reshape(B * S, E), self.w_out_t, self.b_out,
                     out_dtype=jnp.float32)               # [B*S, E]
        return out.reshape(B, S, E)


# ---------------------------------------------------------------------------
# Pure-JAX reference (for sanity check)
# ---------------------------------------------------------------------------
def reference_forward(mha, query, key, value):
    B, S, E = query.shape
    H, d_k = mha.head, mha.d_k

    def lin(x, w, b):
        return x @ w.T + b

    qh, kh, vh = [
        lin(x, w, b).reshape(B, S, H, d_k).transpose(0, 2, 1, 3)
        for w, b, x in zip(mha.weights[:3], mha.biases[:3], (query, key, value))
    ]
    scores = jnp.einsum("bhqd,bhkd->bhqk", qh, kh) / math.sqrt(d_k)
    attn = jax.nn.softmax(scores, axis=-1)
    x = jnp.einsum("bhqk,bhkd->bhqd", attn, vh)
    x = x.transpose(0, 2, 1, 3).reshape(B, S, E)
    return lin(x, mha.weights[3], mha.biases[3])


if __name__ == "__main__":
    B, S, E, HEAD = 2, 8, 32, 4

    root = jax.random.PRNGKey(0)
    k_params, k_x, k_k, k_v = jax.random.split(root, 4)

    x = jax.random.normal(k_x, (B, S, E), dtype=jnp.float32)
    k_in = jax.random.normal(k_k, (B, S, E), dtype=jnp.float32)
    v_in = jax.random.normal(k_v, (B, S, E), dtype=jnp.float32)

    # --- exact f32 configuration ------------------------------------------
    mha = MultiHeadAttentionPallas(HEAD, E, k_params)

    # self-attention -> fully-fused single-kernel path
    out_self = jax.block_until_ready(mha(x, x, x, mask=None))
    ref_self = reference_forward(mha, x, x, x)
    assert out_self.shape == (B, S, E)
    assert jnp.allclose(out_self, ref_self, atol=1e-3, rtol=1e-3), \
        "self-attention mismatch vs reference"

    # cross-attention -> separate-projection fallback path
    out_cross = jax.block_until_ready(mha(x, k_in, v_in, mask=None))
    ref_cross = reference_forward(mha, x, k_in, v_in)
    assert jnp.allclose(out_cross, ref_cross, atol=1e-3, rtol=1e-3), \
        "cross-attention mismatch vs reference"

    # --- bf16-MXU perf configuration (v6e/v7x recommendation), loose check --
    mha_bf16 = MultiHeadAttentionPallas(HEAD, E, k_params,
                                        matmul_dtype=jnp.bfloat16)
    out_bf16 = jax.block_until_ready(mha_bf16(x, x, x, mask=None))
    assert out_bf16.shape == (B, S, E)
    assert jnp.allclose(out_bf16, ref_self, atol=1e-1, rtol=1e-1), \
        "bf16 configuration diverged from reference"

    print("KERNEL_OK")
</pallas_src>

<mosaic_0001>
module attributes {stable_mosaic.version = 11 : i64} {
  func.func @_fused_mha_kernel(%arg0: i32, %arg1: memref<1x8x32xf32, #tpu.memory_space<vmem>>, %arg2: memref<3x32x32xf32, #tpu.memory_space<vmem>>, %arg3: memref<3x1x32xf32, #tpu.memory_space<vmem>>, %arg4: memref<32x32xf32, #tpu.memory_space<vmem>>, %arg5: memref<1x32xf32, #tpu.memory_space<vmem>>, %arg6: memref<1x8x32xf32, #tpu.memory_space<vmem>>, %arg7: memref<8x32xf32, #tpu.memory_space<vmem>>) attributes {dimension_semantics = [#tpu.dimension_semantics<parallel>], iteration_bounds = array<i64: 2>, scalar_prefetch = 0 : i64, scratch_operands = 1 : i64, tpu.core_type = #tpu.core_type<tc>, window_params = [{transform_indices = @transform_0, window_bounds = array<i64: 1, 8, 32>}, {pipeline_mode = #tpu.pipeline_mode<synchronous>, transform_indices = @transform_1, window_bounds = array<i64: 3, 32, 32>}, {pipeline_mode = #tpu.pipeline_mode<synchronous>, transform_indices = @transform_2, window_bounds = array<i64: 3, 1, 32>}, {pipeline_mode = #tpu.pipeline_mode<synchronous>, transform_indices = @transform_3, window_bounds = array<i64: 32, 32>}, {pipeline_mode = #tpu.pipeline_mode<synchronous>, transform_indices = @transform_4, window_bounds = array<i64: 1, 32>}, {transform_indices = @transform_5, window_bounds = array<i64: 1, 8, 32>}]} {
    %c0 = arith.constant 0 : index
    %c0_0 = arith.constant 0 : index
    %c0_1 = arith.constant 0 : index
    %0 = vector.load %arg1[%c0, %c0_0, %c0_1] : memref<1x8x32xf32, #tpu.memory_space<vmem>>, vector<1x8x32xf32>
    %1 = vector.shape_cast %0 : vector<1x8x32xf32> to vector<8x32xf32>
    %c0_2 = arith.constant 0 : index
    %c0_3 = arith.constant 0 : index
    %c0_4 = arith.constant 0 : index
    %2 = vector.load %arg2[%c0_2, %c0_3, %c0_4] : memref<3x32x32xf32, #tpu.memory_space<vmem>>, vector<1x32x32xf32>
    %3 = vector.shape_cast %2 : vector<1x32x32xf32> to vector<32x32xf32>
    %cst = arith.constant dense<0.000000e+00> : vector<8x32xf32>
    %4 = tpu.matmul %1, %3, %cst {dimension_numbers = #tpu.dot_dimension_numbers<[1], [0], [0], [1], [0, 0, 1, 1], [], []>} : vector<8x32xf32>, vector<32x32xf32>, vector<8x32xf32> -> vector<8x32xf32>
    %c0_5 = arith.constant 0 : index
    %c0_6 = arith.constant 0 : index
    %c0_7 = arith.constant 0 : index
    %5 = vector.load %arg3[%c0_5, %c0_6, %c0_7] : memref<3x1x32xf32, #tpu.memory_space<vmem>>, vector<1x1x32xf32>
    %6 = vector.shape_cast %5 : vector<1x1x32xf32> to vector<1x32xf32>
    %7 = vector.broadcast %6 : vector<1x32xf32> to vector<8x32xf32>
    %8 = arith.addf %4, %7 : vector<8x32xf32>
    %c1 = arith.constant 1 : index
    %c0_8 = arith.constant 0 : index
    %c0_9 = arith.constant 0 : index
    %9 = vector.load %arg2[%c1, %c0_8, %c0_9] : memref<3x32x32xf32, #tpu.memory_space<vmem>>, vector<1x32x32xf32>
    %10 = vector.shape_cast %9 : vector<1x32x32xf32> to vector<32x32xf32>
    %cst_10 = arith.constant dense<0.000000e+00> : vector<8x32xf32>
    %11 = tpu.matmul %1, %10, %cst_10 {dimension_numbers = #tpu.dot_dimension_numbers<[1], [0], [0], [1], [0, 0, 1, 1], [], []>} : vector<8x32xf32>, vector<32x32xf32>, vector<8x32xf32> -> vector<8x32xf32>
    %c1_11 = arith.constant 1 : index
    %c0_12 = arith.constant 0 : index
    %c0_13 = arith.constant 0 : index
    %12 = vector.load %arg3[%c1_11, %c0_12, %c0_13] : memref<3x1x32xf32, #tpu.memory_space<vmem>>, vector<1x1x32xf32>
    %13 = vector.shape_cast %12 : vector<1x1x32xf32> to vector<1x32xf32>
    %14 = vector.broadcast %13 : vector<1x32xf32> to vector<8x32xf32>
    %15 = arith.addf %11, %14 : vector<8x32xf32>
    %c2 = arith.constant 2 : index
    %c0_14 = arith.constant 0 : index
    %c0_15 = arith.constant 0 : index
    %16 = vector.load %arg2[%c2, %c0_14, %c0_15] : memref<3x32x32xf32, #tpu.memory_space<vmem>>, vector<1x32x32xf32>
    %17 = vector.shape_cast %16 : vector<1x32x32xf32> to vector<32x32xf32>
    %cst_16 = arith.constant dense<0.000000e+00> : vector<8x32xf32>
    %18 = tpu.matmul %1, %17, %cst_16 {dimension_numbers = #tpu.dot_dimension_numbers<[1], [0], [0], [1], [0, 0, 1, 1], [], []>} : vector<8x32xf32>, vector<32x32xf32>, vector<8x32xf32> -> vector<8x32xf32>
    %c2_17 = arith.constant 2 : index
    %c0_18 = arith.constant 0 : index
    %c0_19 = arith.constant 0 : index
    %19 = vector.load %arg3[%c2_17, %c0_18, %c0_19] : memref<3x1x32xf32, #tpu.memory_space<vmem>>, vector<1x1x32xf32>
    %20 = vector.shape_cast %19 : vector<1x1x32xf32> to vector<1x32xf32>
    %21 = vector.broadcast %20 : vector<1x32xf32> to vector<8x32xf32>
    %22 = arith.addf %18, %21 : vector<8x32xf32>
    %23 = vector.extract_strided_slice %8 {offsets = [0, 0], sizes = [8, 8], strides = [1, 1]} : vector<8x32xf32> to vector<8x8xf32>
    %24 = vector.extract_strided_slice %15 {offsets = [0, 0], sizes = [8, 8], strides = [1, 1]} : vector<8x32xf32> to vector<8x8xf32>
    %cst_20 = arith.constant dense<0.000000e+00> : vector<8x8xf32>
    %25 = tpu.matmul %23, %24, %cst_20 {dimension_numbers = #tpu.dot_dimension_numbers<[1], [1], [0], [0], [0, 0, 1, 0], [], []>} : vector<8x8xf32>, vector<8x8xf32>, vector<8x8xf32> -> vector<8x8xf32>
    %cst_21 = arith.constant dense<0xFF800000> : vector<8xf32>
    %26 = vector.multi_reduction <maximumf>, %25, %cst_21 [1] : vector<8x8xf32> to vector<8xf32>
    %27 = vector.shape_cast %26 : vector<8xf32> to vector<8x1xf32>
    %28 = vector.broadcast %27 : vector<8x1xf32> to vector<8x8xf32>
    %29 = arith.subf %25, %28 : vector<8x8xf32>
    %30 = math.exp %29 : vector<8x8xf32>
    %cst_22 = arith.constant dense<0.000000e+00> : vector<8xf32>
    %31 = vector.multi_reduction <add>, %30, %cst_22 [1] : vector<8x8xf32> to vector<8xf32>
    %32 = vector.shape_cast %31 : vector<8xf32> to vector<8x1xf32>
    %33 = tpu.reciprocal %32 : vector<8x1xf32> -> vector<8x1xf32>
    %34 = vector.broadcast %33 : vector<8x1xf32> to vector<8x8xf32>
    %35 = arith.mulf %30, %34 : vector<8x8xf32>
    %36 = vector.extract_strided_slice %22 {offsets = [0, 0], sizes = [8, 8], strides = [1, 1]} : vector<8x32xf32> to vector<8x8xf32>
    %cst_23 = arith.constant dense<0.000000e+00> : vector<8x8xf32>
    %37 = tpu.matmul %35, %36, %cst_23 {dimension_numbers = #tpu.dot_dimension_numbers<[1], [0], [0], [1], [0, 0, 1, 1], [], []>} : vector<8x8xf32>, vector<8x8xf32>, vector<8x8xf32> -> vector<8x8xf32>
    %c0_24 = arith.constant 0 : index
    %c0_25 = arith.constant 0 : index
    %38 = vector.load %arg7[%c0_24, %c0_25] : memref<8x32xf32, #tpu.memory_space<vmem>>, vector<8x8xf32>
    tpu.vector_store %arg7[%c0_24, %c0_25], %37 {strides = array<i32>} : memref<8x32xf32, #tpu.memory_space<vmem>>, vector<8x8xf32>,
    %39 = vector.extract_strided_slice %8 {offsets = [0, 8], sizes = [8, 8], strides = [1, 1]} : vector<8x32xf32> to vector<8x8xf32>
    %40 = vector.extract_strided_slice %15 {offsets = [0, 8], sizes = [8, 8], strides = [1, 1]} : vector<8x32xf32> to vector<8x8xf32>
    %cst_26 = arith.constant dense<0.000000e+00> : vector<8x8xf32>
    %41 = tpu.matmul %39, %40, %cst_26 {dimension_numbers = #tpu.dot_dimension_numbers<[1], [1], [0], [0], [0, 0, 1, 0], [], []>} : vector<8x8xf32>, vector<8x8xf32>, vector<8x8xf32> -> vector<8x8xf32>
    %cst_27 = arith.constant dense<0xFF800000> : vector<8xf32>
    %42 = vector.multi_reduction <maximumf>, %41, %cst_27 [1] : vector<8x8xf32> to vector<8xf32>
    %43 = vector.shape_cast %42 : vector<8xf32> to vector<8x1xf32>
    %44 = vector.broadcast %43 : vector<8x1xf32> to vector<8x8xf32>
    %45 = arith.subf %41, %44 : vector<8x8xf32>
    %46 = math.exp %45 : vector<8x8xf32>
    %cst_28 = arith.constant dense<0.000000e+00> : vector<8xf32>
    %47 = vector.multi_reduction <add>, %46, %cst_28 [1] : vector<8x8xf32> to vector<8xf32>
    %48 = vector.shape_cast %47 : vector<8xf32> to vector<8x1xf32>
    %49 = tpu.reciprocal %48 : vector<8x1xf32> -> vector<8x1xf32>
    %50 = vector.broadcast %49 : vector<8x1xf32> to vector<8x8xf32>
    %51 = arith.mulf %46, %50 : vector<8x8xf32>
    %52 = vector.extract_strided_slice %22 {offsets = [0, 8], sizes = [8, 8], strides = [1, 1]} : vector<8x32xf32> to vector<8x8xf32>
    %cst_29 = arith.constant dense<0.000000e+00> : vector<8x8xf32>
    %53 = tpu.matmul %51, %52, %cst_29 {dimension_numbers = #tpu.dot_dimension_numbers<[1], [0], [0], [1], [0, 0, 1, 1], [], []>} : vector<8x8xf32>, vector<8x8xf32>, vector<8x8xf32> -> vector<8x8xf32>
    %c0_30 = arith.constant 0 : index
    %c8 = arith.constant 8 : index
    %54 = vector.load %arg7[%c0_30, %c8] : memref<8x32xf32, #tpu.memory_space<vmem>>, vector<8x8xf32>
    tpu.vector_store %arg7[%c0_30, %c8], %53 {strides = array<i32>} : memref<8x32xf32, #tpu.memory_space<vmem>>, vector<8x8xf32>,
    %55 = vector.extract_strided_slice %8 {offsets = [0, 16], sizes = [8, 8], strides = [1, 1]} : vector<8x32xf32> to vector<8x8xf32>
    %56 = vector.extract_strided_slice %15 {offsets = [0, 16], sizes = [8, 8], strides = [1, 1]} : vector<8x32xf32> to vector<8x8xf32>
    %cst_31 = arith.constant dense<0.000000e+00> : vector<8x8xf32>
    %57 = tpu.matmul %55, %56, %cst_31 {dimension_numbers = #tpu.dot_dimension_numbers<[1], [1], [0], [0], [0, 0, 1, 0], [], []>} : vector<8x8xf32>, vector<8x8xf32>, vector<8x8xf32> -> vector<8x8xf32>
    %cst_32 = arith.constant dense<0xFF800000> : vector<8xf32>
    %58 = vector.multi_reduction <maximumf>, %57, %cst_32 [1] : vector<8x8xf32> to vector<8xf32>
    %59 = vector.shape_cast %58 : vector<8xf32> to vector<8x1xf32>
    %60 = vector.broadcast %59 : vector<8x1xf32> to vector<8x8xf32>
    %61 = arith.subf %57, %60 : vector<8x8xf32>
    %62 = math.exp %61 : vector<8x8xf32>
    %cst_33 = arith.constant dense<0.000000e+00> : vector<8xf32>
    %63 = vector.multi_reduction <add>, %62, %cst_33 [1] : vector<8x8xf32> to vector<8xf32>
    %64 = vector.shape_cast %63 : vector<8xf32> to vector<8x1xf32>
    %65 = tpu.reciprocal %64 : vector<8x1xf32> -> vector<8x1xf32>
    %66 = vector.broadcast %65 : vector<8x1xf32> to vector<8x8xf32>
    %67 = arith.mulf %62, %66 : vector<8x8xf32>
    %68 = vector.extract_strided_slice %22 {offsets = [0, 16], sizes = [8, 8], strides = [1, 1]} : vector<8x32xf32> to vector<8x8xf32>
    %cst_34 = arith.constant dense<0.000000e+00> : vector<8x8xf32>
    %69 = tpu.matmul %67, %68, %cst_34 {dimension_numbers = #tpu.dot_dimension_numbers<[1], [0], [0], [1], [0, 0, 1, 1], [], []>} : vector<8x8xf32>, vector<8x8xf32>, vector<8x8xf32> -> vector<8x8xf32>
    %c0_35 = arith.constant 0 : index
    %c16 = arith.constant 16 : index
    %70 = vector.load %arg7[%c0_35, %c16] : memref<8x32xf32, #tpu.memory_space<vmem>>, vector<8x8xf32>
    tpu.vector_store %arg7[%c0_35, %c16], %69 {strides = array<i32>} : memref<8x32xf32, #tpu.memory_space<vmem>>, vector<8x8xf32>,
    %71 = vector.extract_strided_slice %8 {offsets = [0, 24], sizes = [8, 8], strides = [1, 1]} : vector<8x32xf32> to vector<8x8xf32>
    %72 = vector.extract_strided_slice %15 {offsets = [0, 24], sizes = [8, 8], strides = [1, 1]} : vector<8x32xf32> to vector<8x8xf32>
    %cst_36 = arith.constant dense<0.000000e+00> : vector<8x8xf32>
    %73 = tpu.matmul %71, %72, %cst_36 {dimension_numbers = #tpu.dot_dimension_numbers<[1], [1], [0], [0], [0, 0, 1, 0], [], []>} : vector<8x8xf32>, vector<8x8xf32>, vector<8x8xf32> -> vector<8x8xf32>
    %cst_37 = arith.constant dense<0xFF800000> : vector<8xf32>
    %74 = vector.multi_reduction <maximumf>, %73, %cst_37 [1] : vector<8x8xf32> to vector<8xf32>
    %75 = vector.shape_cast %74 : vector<8xf32> to vector<8x1xf32>
    %76 = vector.broadcast %75 : vector<8x1xf32> to vector<8x8xf32>
    %77 = arith.subf %73, %76 : vector<8x8xf32>
    %78 = math.exp %77 : vector<8x8xf32>
    %cst_38 = arith.constant dense<0.000000e+00> : vector<8xf32>
    %79 = vector.multi_reduction <add>, %78, %cst_38 [1] : vector<8x8xf32> to vector<8xf32>
    %80 = vector.shape_cast %79 : vector<8xf32> to vector<8x1xf32>
    %81 = tpu.reciprocal %80 : vector<8x1xf32> -> vector<8x1xf32>
    %82 = vector.broadcast %81 : vector<8x1xf32> to vector<8x8xf32>
    %83 = arith.mulf %78, %82 : vector<8x8xf32>
    %84 = vector.extract_strided_slice %22 {offsets = [0, 24], sizes = [8, 8], strides = [1, 1]} : vector<8x32xf32> to vector<8x8xf32>
    %cst_39 = arith.constant dense<0.000000e+00> : vector<8x8xf32>
    %85 = tpu.matmul %83, %84, %cst_39 {dimension_numbers = #tpu.dot_dimension_numbers<[1], [0], [0], [1], [0, 0, 1, 1], [], []>} : vector<8x8xf32>, vector<8x8xf32>, vector<8x8xf32> -> vector<8x8xf32>
    %c0_40 = arith.constant 0 : index
    %c24 = arith.constant 24 : index
    %86 = vector.load %arg7[%c0_40, %c24] : memref<8x32xf32, #tpu.memory_space<vmem>>, vector<8x8xf32>
    tpu.vector_store %arg7[%c0_40, %c24], %85 {strides = array<i32>} : memref<8x32xf32, #tpu.memory_space<vmem>>, vector<8x8xf32>,
    %c0_41 = arith.constant 0 : index
    %c0_42 = arith.constant 0 : index
    %87 = vector.load %arg7[%c0_41, %c0_42] : memref<8x32xf32, #tpu.memory_space<vmem>>, vector<8x32xf32>
    %c0_43 = arith.constant 0 : index
    %c0_44 = arith.constant 0 : index
    %88 = vector.load %arg4[%c0_43, %c0_44] : memref<32x32xf32, #tpu.memory_space<vmem>>, vector<32x32xf32>
    %cst_45 = arith.constant dense<0.000000e+00> : vector<8x32xf32>
    %89 = tpu.matmul %87, %88, %cst_45 {dimension_numbers = #tpu.dot_dimension_numbers<[1], [0], [0], [1], [0, 0, 1, 1], [], []>} : vector<8x32xf32>, vector<32x32xf32>, vector<8x32xf32> -> vector<8x32xf32>
    %c0_46 = arith.constant 0 : index
    %c0_47 = arith.constant 0 : index
    %90 = vector.load %arg5[%c0_46, %c0_47] : memref<1x32xf32, #tpu.memory_space<vmem>>, vector<1x32xf32>
    %91 = vector.broadcast %90 : vector<1x32xf32> to vector<8x32xf32>
    %92 = arith.addf %89, %91 : vector<8x32xf32>
    %c0_48 = arith.constant 0 : index
    %c0_49 = arith.constant 0 : index
    %c0_50 = arith.constant 0 : index
    %93 = vector.load %arg6[%c0_48, %c0_49, %c0_50] : memref<1x8x32xf32, #tpu.memory_space<vmem>>, vector<1x8x32xf32>
    %94 = vector.shape_cast %93 : vector<1x8x32xf32> to vector<8x32xf32>
    %95 = vector.shape_cast %92 : vector<8x32xf32> to vector<1x8x32xf32>
    tpu.vector_store %arg6[%c0_48, %c0_49, %c0_50], %95 {strides = array<i32>} : memref<1x8x32xf32, #tpu.memory_space<vmem>>, vector<1x8x32xf32>,
    return
  }
  func.func @transform_0(%arg0: i32) -> (i32, i32, i32) {
    %c0_i32 = arith.constant 0 : i32
    %c0_i32_0 = arith.constant 0 : i32
    %c0_i32_1 = arith.constant 0 : i32
    return %arg0, %c0_i32, %c0_i32_0 : i32, i32, i32
  }
  func.func @transform_1(%arg0: i32) -> (i32, i32, i32) {
    %c0_i32 = arith.constant 0 : i32
    %c0_i32_0 = arith.constant 0 : i32
    %c0_i32_1 = arith.constant 0 : i32
    %c0_i32_2 = arith.constant 0 : i32
    return %c0_i32, %c0_i32_0, %c0_i32_1 : i32, i32, i32
  }
  func.func @transform_2(%arg0: i32) -> (i32, i32, i32) {
    %c0_i32 = arith.constant 0 : i32
    %c0_i32_0 = arith.constant 0 : i32
    %c0_i32_1 = arith.constant 0 : i32
    %c0_i32_2 = arith.constant 0 : i32
    return %c0_i32, %c0_i32_0, %c0_i32_1 : i32, i32, i32
  }
  func.func @transform_3(%arg0: i32) -> (i32, i32) {
    %c0_i32 = arith.constant 0 : i32
    %c0_i32_0 = arith.constant 0 : i32
    %c0_i32_1 = arith.constant 0 : i32
    return %c0_i32, %c0_i32_0 : i32, i32
  }
  func.func @transform_4(%arg0: i32) -> (i32, i32) {
    %c0_i32 = arith.constant 0 : i32
    %c0_i32_0 = arith.constant 0 : i32
    %c0_i32_1 = arith.constant 0 : i32
    return %c0_i32, %c0_i32_0 : i32, i32
  }
  func.func @transform_5(%arg0: i32) -> (i32, i32, i32) {
    %c0_i32 = arith.constant 0 : i32
    %c0_i32_0 = arith.constant 0 : i32
    %c0_i32_1 = arith.constant 0 : i32
    return %arg0, %c0_i32, %c0_i32_0 : i32, i32, i32
  }
}

</mosaic_0001>

<bundles_post_ra>
// kernel: tpu_custom_call.1
= control target key start
LH: loop header
LB: loop body
LE: loop exit
PB: predicated region body
PF: predicated region fallthrough
CT: control target
= control target key end

     0   :  { %10 = vsyncpa [#allocation4], 0  ;;  %s2107_s0 = inlined_call_operand.hbm [shape: f32[2,8,32], index: 0, kind: input, shape index: {}]   ;;  %s2108_s1 = inlined_call_operand.hbm [shape: f32[3,32,32], index: 1, kind: input, shape index: {}]   ;;  %s2109_s2 = inlined_call_operand.vmem [shape: f32[3,1,32], index: 2, kind: input, shape index: {}]   ;;  %s2110_s3 = inlined_call_operand.hbm [shape: f32[32,32], index: 3, kind: input, shape index: {}]   ;;  %s2111_s4 = inlined_call_operand.vmem [shape: f32[1,32], index: 4, kind: input, shape index: {}]   ;;  %s2112_s5 = inlined_call_operand.hbm [shape: f32[2,8,32], index: 5, kind: output, shape index: {}]  }
   0x1   :  { %12 = vsyncpa [#allocation4 + $0x1], 0 }
   0x2   :  { %13 = vsyncpa [#allocation7], 0 }
   0x3   :  { %14 = vsyncpa [#allocation5], 0 }
   0x4   :  { %16 = vsyncpa [#allocation5 + $0x1], 0  ;;  %s1831_s18 = smov 0   ;;  %s1833_s19 = smov 0  }
   0x5   :  { %s1835_s20 = smov 0   ;;  %s1837_s21 = smov 0  }
   0x6 LB: > { %s1852_s22 = sadd.s32 4294967295, %s1785_s21   ;;  %s1386_s23 = sadd.s32 4294967294, %s1785_s21   ;;  %s1785_s21 = sphi %s1837_s21, %s2134_s21   ;;  %s1781_s20 = sphi %s1835_s20, %s2133_s20   ;;  %s1777_s19 = sphi %s1833_s19, %s2132_s19   ;;  %s1773_s18 = sphi %s1831_s18, %s2131_s18  }
   0x7   : > { %p42_p0 = scmp.ne.s32.totalorder %s1777_s19, %s1773_s18  ;;  %p2113_p1 = scmp.eq.s32.totalorder %s1852_s22, 0 }
   0x8   : > { %p156_p3 = scmp.eq.s32.totalorder %s1386_s23, 1  ;;  %p1387_p5 = scmp.ge.s32.totalorder %s1785_s21, 1 }
   0x9   : > { %p1861_p4 = por %p2113_p1, %p42_p0  ;;  %p163_p7 = scmp.lt.s32.totalorder %s1785_s21, 3 }
   0xa   : > { %p1866_p6 = por %p156_p3, %p42_p0  ;;  %s1787_s27 = smov [#allocation6]  }
   0xb   : > { %s2117_s24 = scalar_select %p1861_p4, 1, 0 }
   0xc   : > { %s2118_s25 = scalar_select %p1866_p6, 1, 0 }
   0xd   : > { %p1871_p8 = pnand %p1387_p5, %p163_p7  ;;  %s175_s28 = sshll.u32 %s1787_s27, 4  ;;  %s176_s28 = int_to_ptr.vmem [resolvable:$true] %s175_s28 }
   0xe   : > { %s1788_s30 = smov [#allocation8]   ;;  %s1648_s7 = scalar_lea.vmem %s176_s28, 1536 }
   0xf   : > { %s2119_s26 = scalar_select %p1871_p8, 1, 0 }
  0x10   : > { %p1556_p9 = pneg %p1871_p8  ;;  %s191_s6 = sshll.u32 %s1788_s30, 4  ;;  %s192_s6 = int_to_ptr.vmem [resolvable:$true] %s191_s6 }
  0x11   : > { %p1649_p13 = scmp.ne.s32.totalorder %s176_s28, %s1648_s7  ;;  %p1656_p5 = scmp.lt.s32.totalorder %s176_s28, %s176_s28 }
  0x12   : > { %p1880_p11 = pnand %p1556_p9, %p2113_p1  ;;  %p1657_p7 = scmp.lt.s32.totalorder %s1648_s7, %s1648_s7 }
  0x14   : > { %p1639_p12 = pneg %p1880_p11  ;;  %p1658_p10 = por %p1657_p7, %p1656_p5 }
  0x16   : > { %p1651_p0 = pnand %p1649_p13, %p1639_p12 }
  0x18   : > { %p1652_p3 = pneg %p1651_p0 }
  0x1a   : > { %p1659_p9 = pnand %p1658_p10, %p1652_p3 }
  0x1c   : > { %1662 = shalt.err (!%p1659_p9)
}
  0x1d   : > { %s1789_s8 = smov 128   ;;  %s1790_s9 = smov 8  }
  0x1e   : > { %1559 = dma.hbm_to_vmem [thread:$0]  (!%p1880_p11), %s2108_s1, 1536, %s176_s28, [#allocation7], %s1789_s8, %s1789_s8, %s1790_s9  }
  0x1f   : > { %s1674_s12 = scalar_lea.vmem %s192_s6, 512  ;;  %p1682_p2 = scmp.lt.s32.totalorder %s192_s6, %s192_s6 }
  0x20   : > { %p1675_p1 = scmp.ne.s32.totalorder %s192_s6, %s1674_s12  ;;  %p1683_p6 = scmp.lt.s32.totalorder %s1674_s12, %s1674_s12 }
  0x22   : > { %p1677_p13 = pnand %p1675_p1, %p1639_p12  ;;  %p1684_p5 = por %p1683_p6, %p1682_p2 }
  0x24   : > { %p1678_p0 = pneg %p1677_p13 }
  0x26   : > { %p1685_p10 = pnand %p1684_p5, %p1678_p0 }
  0x28   : > { %1688 = shalt.err (!%p1685_p10)
}
  0x29   : > { %1562 = dma.hbm_to_vmem [thread:$0]  (!%p1880_p11), %s2110_s3, 512, %s192_s6, [#allocation7], %s1789_s8, %s1789_s8, %s1790_s9  }
  0x2a   : > { %s1903_s15 = sadd.s32 1, %s1785_s21   ;;  %s29_s16 = sadd.s32 1, %s1781_s20 }
  0x2b   : > { %s26_s17 = ssub.s32 %s1785_s21, %s1903_s15  ;;  %p36_p1 = scmp.ne.s32.totalorder %s1781_s20, %s1777_s19 }
  0x2c   : > { %p27_p2 = scmp.eq.s32.totalorder %s26_s17, 0  ;;  %p37_p6 = scmp.eq.s32.totalorder %s1785_s21, 0 }
  0x2d   : > { %p2121_p12 = scmp.eq.s32.totalorder %s1852_s22, 1  ;;  %p1573_p7 = scmp.lt.s32.totalorder %s1785_s21, 2 }
  0x2e   : > { %s1919_s27 = scalar_select %p27_p2, %s1781_s20, %s29_s16  }
  0x2f   : > { %p1913_p3 = por %p2121_p12, %p36_p1  ;;  %p38_p9 = por %p37_p6, %p36_p1 }
  0x30   : > { %s208_s28 = sand.u32 1, %s1781_s20   ;;  %s1392_s30 = sshll.u32 %s1785_s21, 7 }
  0x31   : > { %s2122_s23 = scalar_select %p1913_p3, 1, 0 }
  0x32   : > { %s1391_s29 = sshll.u32 %s208_s28, 3  ;;  %s1926_s8 = scalar_lea.hbm %s2107_s0, %s1392_s30 }
  0x33   : > { %s212_s9 = scalar_lea.vmem [#allocation3], %s1391_s29  ;;  %p1928_p11 = pnand %p1573_p7, %p38_p9 }
  0x34   : > { %s219_s10 = sshll.u32 %s212_s9, 4  ;;  %s209_s12 = scalar_lea.sflag [#allocation4], %s208_s28  ;;  %s220_s10 = int_to_ptr.vmem [resolvable:$true] %s219_s10 }
  0x35   : > { %s1689_s13 = scalar_lea.hbm %s1926_s8, 128  ;;  %p1691_p0 = pneg %p1928_p11 }
  0x36   : > { %p1690_p13 = scmp.ne.s32.totalorder %s1926_s8, %s1689_s13  ;;  %s1694_s17 = scalar_lea.hbm %s2107_s0, 256 }
  0x37   : > { %p1695_p1 = scmp.lt.s32.totalorder %s1926_s8, %s2107_s0  ;;  %p1696_p2 = scmp.lt.s32.totalorder %s1694_s17, %s1689_s13 }
  0x38   : > { %p1692_p5 = pnand %p1691_p0, %p1690_p13 }
  0x39   : > { %p1697_p6 = por %p1696_p2, %p1695_p1 }
  0x3a   : > { %p1693_p10 = pneg %p1692_p5 }
  0x3c   : > { %p1698_p12 = pnand %p1697_p6, %p1693_p10 }
  0x3e   : > { %1701 = shalt.err (!%p1698_p12)
}
  0x3f   : > { %s1702_s6 = scalar_lea.vmem %s220_s10, 128  ;;  %s1791_s28 = smov [#allocation3]  }
  0x40   : > { %p1703_p7 = scmp.ne.s32.totalorder %s220_s10, %s1702_s6  ;;  %s1707_s7 = sshll.u32 %s1791_s28, 4  ;;  %s1708_s7 = int_to_ptr.vmem [resolvable:$false] %s1707_s7 }
  0x41   : > { %s1709_s9 = scalar_lea.vmem %s1708_s7, 256  ;;  %p1710_p13 = scmp.lt.s32.totalorder %s220_s10, %s1708_s7 }
  0x42   : > { %p1705_p9 = pnand %p1703_p7, %p1691_p0  ;;  %p1711_p5 = scmp.lt.s32.totalorder %s1709_s9, %s1702_s6 }
  0x44   : > { %p1706_p3 = pneg %p1705_p9  ;;  %p1712_p4 = por %p1711_p5, %p1710_p13 }
  0x46   : > { %p1713_p8 = pnand %p1712_p4, %p1706_p3 }
  0x48   : > { %1716 = shalt.err (!%p1713_p8)
}
  0x49   : > { %1566 = dma.hbm_to_vmem [thread:$0]  (!%p1928_p11), %s1926_s8, 128, %s220_s10, %s209_s12  }
  0x4a   : > { %p2124_p10 = scmp.ne.s32.totalorder %s2119_s26, 0 }
  0x4b   : > { %s1949_s13 = sand.u32 (!%p2124_p10), 1, %s1777_s19   ;;  %p2125_p4 = scmp.ne.s32.totalorder (!%p2124_p10), %s2117_s24, 0 }
  0x4c   : > { %228 = sbr.rel (%p2124_p10) target bundleno = 1896 (0x768), region = 40  ;;  %s1394_s14 = sshll.u32 (!%p2124_p10), %s1949_s13, 3 }
  0x4d   : > { %s231_s16 = scalar_lea.sflag (!%p2124_p10), [#allocation4], %s1949_s13  ;;  %s234_s17 = scalar_lea.vmem (!%p2124_p10), [#allocation3], %s1394_s14 }
  0x51   : > { %1760 = dma.done.wait (%p2125_p4), %s231_s16, 128  }
  0x52   : > { %1762 = vsyncadd (%p2125_p4), %s231_s16, 4294967168  ;;  %p2126_p8 = scmp.eq.s32.totalorder %s1852_s22, 0 }
  0x54   : > { %1764 = dma.done.wait (%p2126_p8), [#allocation7], 2048   ;;  %p2127_p3 = pmov %p2126_p8 }
  0x55   : > { %v1792_v0 = vmov 0.0   ;;  %vm1793_vm0 = vmmov 0   ;;  %v359_v1 = vld [vmem:[#allocation6 + $0x38] sm:$0xff]  ;;  %v358_v3 = vld [vmem:[#allocation6 + $0x30] sm:$0xff]  ;;  %v357_v5 = vld [vmem:[#allocation6 + $0x28] sm:$0xff]  ;;  %vm281_vm1 = vcmask 261120  }
  0x56   : > { %1766 = vsyncadd (%p2127_p3), [#allocation7], 4294965248  ;;  %1471 = vmatprep.subr.mxu1 %v1792_v0  ;;  %1460 = vmatprep.subr.mxu0 %v1792_v0  ;;  %v273_v2 = vld [vmem:[#allocation6 + $0x18] sm:$0xff]  ;;  %v272_v4 = vld [vmem:[#allocation6 + $0x10] sm:$0xff]  ;;  %vm521_vm2 = vcmask 64512   ;;  %s1794_s11 = smov 120  }
  0x57   : > { %1479 = vmatprep.mubr.msk.f32.mxu1 %vm1793_vm0, %v1792_v0  ;;  %1468 = vmatprep.mubr.msk.f32.mxu0 %vm1793_vm0, %v1792_v0  ;;  %v271_v6 = vld [vmem:[#allocation6 + $0x8] sm:$0xff]  ;;  %v356_v7 = vld [vmem:[#allocation6 + $0x20] sm:$0xff]  ;;  %v269_v9 = vld [vmem:[%s234_s17] sm:$0xff]  ;;  %s1795_s12 = smov 112   ;;  %s1796_s30 = smov 104   ;;  %vm853_vm3 = vcmask 130112  }
  0x58   : > { %1472 = vmatpush3.msra.mxu1 %v359_v1  ;;  %1461 = vmatpush3.msra.mxu0 %v273_v2  ;;  %v270_v8 = vld [vmem:[#allocation6] sm:$0xff]  ;;  %v1401_v10 = vld [vmem:[%s2109_s2 + $0x1] ss:$0 sm:$0xff]  ;;  %v1398_v11 = vld [vmem:[%s2109_s2] ss:$0 sm:$0xff]  ;;  %s1797_s28 = smov 8  }
  0x59   : > { %1473 = vmatprep.subr.mxu1 %v1792_v0  ;;  %1462 = vmatprep.subr.mxu0 %v1792_v0  ;;  %v442_v18 = vld [vmem:[#allocation6 + $0x58] sm:$0xff]  ;;  %v441_v19 = vld [vmem:[#allocation6 + $0x50] sm:$0xff]  ;;  %v440_v20 = vld [vmem:[#allocation6 + $0x48] sm:$0xff]  ;;  %s1798_s7 = smov 16   ;;  %s1799_s9 = smov 24   ;;  %vm1024_vm4 = vcmask 195712  }
  0x5a   : > { %1474 = vmatpush3.msra.mxu1 %v358_v3  ;;  %1463 = vmatpush3.msra.mxu0 %v272_v4  ;;  %v439_v21 = vld [vmem:[#allocation6 + $0x40] sm:$0xff]  ;;  %v1404_v30 = vld [vmem:[%s2109_s2 + $0x2] ss:$0 sm:$0xff]  ;;  %vm1195_vm5 = vcmask 261312   ;;  %s1421_s24 = sshll.u32 %s1852_s22, 7  ;;  %s268_s26 = scalar_lea.vmem [#allocation9], %s1394_s14 }
  0x5b   : > { %1475 = vmatprep.subr.mxu1 %v1792_v0  ;;  %1464 = vmatprep.subr.mxu0 %v1792_v0  ;;  %s1297_s8 = sshll.u32 %s268_s26, 4  ;;  %p2128_p0 = scmp.ne.s32.totalorder %s2122_s23, 0  ;;  %s1298_s8 = int_to_ptr.vmem [resolvable:$true] %s1297_s8 }
  0x5c   : > { %1476 = vmatpush3.msra.mxu1 %v357_v5  ;;  %1465 = vmatpush3.msra.mxu0 %v271_v6  ;;  %s1717_s29 = scalar_lea.vmem %s1298_s8, 128  ;;  %s1800_s22 = smov [#allocation9]  }
  0x5d   : > { %1477 = vmatprep.subr.mxu1 %v1792_v0  ;;  %1466 = vmatprep.subr.mxu0 %v1792_v0  ;;  %p1718_p11 = scmp.ne.s32.totalorder %s1298_s8, %s1717_s29  ;;  %s1721_s14 = sshll.u32 %s1800_s22, 4  ;;  %s1722_s14 = int_to_ptr.vmem [resolvable:$false] %s1721_s14 }
  0x5e   : > { %1478 = vmatpush3.msra.mxu1 %v356_v7  ;;  %1467 = vmatpush3.msra.mxu0 %v270_v8  ;;  %s1723_s6 = scalar_lea.vmem %s1722_s14, 256  ;;  %p1724_p6 = scmp.lt.s32.totalorder %s1298_s8, %s1722_s14 }
  0x5f   : > { %1480 = vmatmul.mubr.msk.f32.vlgmr.msra.gmra.mxu1 %vm281_vm1, %v269_v9  ;;  %1469 = vmatmul.mubr.msk.f32.vlgmr.msra.gmra.mxu0 %vm281_vm1, %v269_v9  ;;  %p1719_p1 = pnand %p1718_p11, %p2128_p0  ;;  %p1725_p12 = scmp.lt.s32.totalorder %s1723_s6, %s1717_s29 }
  0x60   : > { %1493 = vmatprep.subr.mxu1 %v1792_v0  ;;  %1495 = vmatprep.mubr.msk.f32.mxu1 %vm1793_vm0, %v1792_v0 }
  0x61   : > { %1482 = vmatprep.subr.mxu0 %v1792_v0  ;;  %1490 = vmatprep.mubr.msk.f32.mxu0 %vm1793_vm0, %v1792_v0  ;;  %p1720_p2 = pneg %p1719_p1  ;;  %p1726_p7 = por %p1725_p12, %p1724_p6 }
  0x62   : > { %1483 = vmatpush3.msra.mxu0 %v442_v18  ;;  %v1201_v18 = vld [vmem:[#allocation8 + $0x18] sm:$0xff] }
  0x63   : > { %1484 = vmatprep.subr.mxu0 %v1792_v0  ;;  %p1727_p9 = pnand %p1726_p7, %p1720_p2 }
  0x64   : > { %1485 = vmatpush3.msra.mxu0 %v441_v19  ;;  %v1200_v19 = vld [vmem:[#allocation8 + $0x10] sm:$0xff] }
  0x65   : > { %1486 = vmatprep.subr.mxu0 %v1792_v0 }
  0x66   : > { %1487 = vmatpush3.msra.mxu0 %v440_v20  ;;  %v1199_v20 = vld [vmem:[#allocation8 + $0x8] sm:$0xff] }
  0x67   : > { %1488 = vmatprep.subr.mxu0 %v1792_v0 }
  0x68   : > { %1489 = vmatpush3.msra.mxu0 %v439_v21 }
  0x69   : > { %1491 = vmatmul.mubr.msk.f32.vlgmr.msra.gmra.mxu0 %vm281_vm1, %v269_v9  ;;  %1513 = vmatprep.subr.mxu0 %v1792_v0 }
  0x6a   : > { %1515 = vmatprep.mubr.msk.f32.mxu0 %vm1793_vm0, %v1792_v0 }
 0x11f   : > { %v434_v12 = vpop.f32.mrf.mxu1  ;;  %v351_v13 = vpop.f32.mrf.mxu0 }
 0x120   : > { %v435_v14 = vadd.f32 %v1401_v10, %v434_v12  ;;  %v352_v15 = vadd.f32 %v1398_v11, %v351_v13 }
 0x121   : > { %v1481_v16 = vpop.f32.mrf.mxu1  ;;  %v1470_v17 = vpop.f32.mrf.mxu0 }
 0x122   : > { %685 = vrot.lane.b32.xlu1 %v435_v14, %s1794_s11  ;;  %1494 = vmatpush3.xpose.msk.msra.mxu1 %vm521_vm2, %v435_v14 }
 0x123   : > { %1498 = vmatprep.subr.mxu1 %v1792_v0 }
 0x125   : > { %1496 = vmatmul.mubr.msk.f32.vlgmr.msra.gmra.mxu1 %vm521_vm2, %v352_v15 }
 0x126   : > { %683 = vrot.lane.b32.xlu1 %v352_v15, %s1794_s11  ;;  %1500 = vmatprep.mubr.msk.f32.mxu1 %vm1793_vm0, %v1792_v0 }
 0x129   : > { %v517_v31 = vpop.f32.mrf.mxu0 }
 0x12a   : > { %855 = vrot.lane.b32.xlu1 %v352_v15, %s1795_s12  ;;  %v2011_v32 = vadd.f32 %v1404_v30, %v517_v31  ;;  %v1418_v31 = vld [vmem:[%s2111_s4] ss:$0 sm:$0xff] }
 0x12b   : > { %v1492_v33 = vpop.f32.mrf.mxu0 }
 0x12c   : > { %1499 = vmatpush3.msra.mxu1 %v2011_v32 }
 0x12d   : > { %1503 = vmatprep.subr.mxu1 %v1792_v0 }
 0x12e   : > { %1028 = vrot.lane.b32.xlu1 %v435_v14, %s1796_s30 }
 0x132   : > { %1026 = vrot.lane.b32.xlu1 %v352_v15, %s1796_s30 }
 0x194   : > { %v686_v34 = vpop.permute.xlu1 %685 }
 0x198   : > { %v684_v35 = vpop.permute.xlu1 %683 }
 0x19c   : > { %v856_v36 = vpop.permute.xlu1 %855 }
 0x1a0   : > { %v1029_v39 = vpop.permute.xlu1 %1028 }
 0x1a4   : > { %v1027_v40 = vpop.permute.xlu1 %1026 }
 0x1e5   : > { %v594_v22 = vpop.f32.mrf.mxu1 }
 0x1e6   : > { %v598_v23 = vsel %vm521_vm2, %v594_v22, -inf }
 0x1e7   : > { %599 = vmax.xlane.f32.xlu0 %v598_v23  ;;  %v1497_v24 = vpop.f32.mrf.mxu1 }
 0x270   : > { %v600_v25 = vpop.xlane.xlu0 %599 }
 0x271   : > { %v601_v26 = vsub.f32 %v594_v22, %v600_v25  ;;  %v1198_v22 = vld [vmem:[#allocation8] sm:$0xff] }
 0x273   : > { %v602_v27 = vmul.f32 1.442695, %v601_v26 }
 0x275   : > { %1621 = vpow2.f32 %v602_v27 }
 0x282   : > { %v1622_v28 = vpop.eup %1621 }
 0x283   : > { %v604_v29 = vsel %vm521_vm2, %v1622_v28, 0.0 }
 0x284   : > { %605 = vadd.xlane.f32.xlu0 %v604_v29 }
 0x29a   : > { %857 = vrot.lane.b32.xlu0 %v435_v14, %s1795_s12 }
 0x30d   : > { %v606_v37 = vpop.xlane.xlu0 %605 }
 0x30e   : > { %1623 = vrcp.f32 %v606_v37 }
 0x311   : > { %v858_v38 = vpop.permute.xlu0 %857 }
 0x312   : > { %1514 = vmatpush3.xpose.msk.msra.mxu0 %vm521_vm2, %v858_v38 }
 0x313   : > { %1523 = vmatprep.subr.mxu0 %v1792_v0 }
 0x315   : > { %1516 = vmatmul.mubr.msk.f32.vlgmr.msra.gmra.mxu0 %vm521_vm2, %v856_v36 }
 0x316   : > { %1524 = vmatpush3.xpose.msk.msra.mxu0 %vm521_vm2, %v1029_v39  ;;  %1525 = vmatprep.mubr.msk.f32.mxu0 %vm1793_vm0, %v1792_v0 }
 0x317   : > { %1533 = vmatprep.subr.mxu0 %v1792_v0 }
 0x319   : > { %1526 = vmatmul.mubr.msk.f32.vlgmr.msra.gmra.mxu0 %vm521_vm2, %v1027_v40 }
 0x31a   : > { %1541 = vmatprep.mubr.msk.f32.mxu0 %vm1793_vm0, %v1792_v0  ;;  %1534 = vmatpush3.msra.mxu0 %v1201_v18 }
 0x31b   : > { %v1624_v41 = vpop.eup %1623  ;;  %1535 = vmatprep.subr.mxu0 %v1792_v0 }
 0x31c   : > { %v608_v42 = vmul.f32 %v1624_v41, %v1622_v28  ;;  %1536 = vmatpush3.msra.mxu0 %v1200_v19 }
 0x31d   : > { %1537 = vmatprep.subr.mxu0 %v1792_v0 }
 0x31e   : > { %1501 = vmatmul.mubr.msk.f32.vlgmr.msra.gmra.mxu1 %vm521_vm2, %v608_v42  ;;  %1538 = vmatpush3.msra.mxu0 %v1199_v20 }
 0x31f   : > { %1504 = vmatpush3.xpose.msk.msra.mxu1 %vm521_vm2, %v686_v34  ;;  %1505 = vmatprep.mubr.msk.f32.mxu1 %vm1793_vm0, %v1792_v0 }
 0x320   : > { %1508 = vmatprep.subr.mxu1 %v1792_v0  ;;  %1539 = vmatprep.subr.mxu0 %v1792_v0 }
 0x321   : > { %1540 = vmatpush3.msra.mxu0 %v1198_v22 }
 0x322   : > { %1506 = vmatmul.mubr.msk.f32.vlgmr.msra.gmra.mxu1 %vm521_vm2, %v684_v35 }
 0x323   : > { %1510 = vmatprep.mubr.msk.f32.mxu1 %vm1793_vm0, %v1792_v0 }
 0x3d5   : > { %v929_v43 = vpop.f32.mrf.mxu0 }
 0x3d6   : > { %v933_v44 = vsel %vm521_vm2, %v929_v43, -inf }
 0x3d7   : > { %934 = vmax.xlane.f32.xlu0 %v933_v44  ;;  %v1517_v45 = vpop.f32.mrf.mxu0 }
 0x3d9   : > { %v1100_v46 = vpop.f32.mrf.mxu0 }
 0x3da   : > { %v1104_v53 = vsel %vm521_vm2, %v1100_v46, -inf }
 0x3db   : > { %v1527_v47 = vpop.f32.mrf.mxu0 }
 0x3de   : > { %v678_v48 = vpop.f32.mrf.mxu1 }
 0x3df   : > { %682 = vst.msk [vmem:[#allocation2] sm:$0xff] %vm521_vm2, %v678_v48 }
 0x3e0   : > { %v1502_v49 = vpop.f32.mrf.mxu1 }
 0x3e2   : > { %v757_v50 = vpop.f32.mrf.mxu1 }
 0x3e3   : > { %v761_v51 = vsel %vm521_vm2, %v757_v50, -inf }
 0x3e4   : > { %762 = vmax.xlane.f32.xlu1 %v761_v51  ;;  %v1507_v52 = vpop.f32.mrf.mxu1 }
 0x3e8   : > { %1105 = vmax.xlane.f32.xlu1 %v1104_v53 }
 0x460   : > { %v935_v54 = vpop.xlane.xlu0 %934 }
 0x461   : > { %v936_v55 = vsub.f32 %v929_v43, %v935_v54 }
 0x463   : > { %v937_v56 = vmul.f32 1.442695, %v936_v55 }
 0x465   : > { %1625 = vpow2.f32 %v937_v56 }
 0x46d   : > { %v763_v57 = vpop.xlane.xlu1 %762 }
 0x46e   : > { %v764_v2 = vsub.f32 %v757_v50, %v763_v57 }
 0x470   : > { %v765_v3 = vmul.f32 1.442695, %v764_v2 }
 0x471   : > { %v1106_v58 = vpop.xlane.xlu1 %1105 }
 0x472   : > { %v1626_v59 = vpop.eup %1625  ;;  %v1107_v60 = vsub.f32 %v1100_v46, %v1106_v58 }
 0x473   : > { %v939_v61 = vsel %vm521_vm2, %v1626_v59, 0.0 }
 0x474   : > { %v1108_v62 = vmul.f32 1.442695, %v1107_v60  ;;  %940 = vadd.xlane.f32.xlu0 %v939_v61 }
 0x476   : > { %1627 = vpow2.f32 %v1108_v62 }
 0x477   : > { %1629 = vpow2.f32 %v765_v3 }
 0x483   : > { %v1628_v63 = vpop.eup %1627 }
 0x484   : > { %v1110_v1 = vsel %vm521_vm2, %v1628_v63, 0.0  ;;  %v1630_v4 = vpop.eup %1629 }
 0x485   : > { %1111 = vadd.xlane.f32.xlu1 %v1110_v1  ;;  %v767_v5 = vsel %vm521_vm2, %v1630_v4, 0.0 }
 0x48a   : > { %773 = vrot.lane.b32.xlu0 %v2011_v32, %s1794_s11 }
 0x496   : > { %944 = vrot.lane.b32.xlu1 %v2011_v32, %s1795_s12  ;;  %s2069_s12 = scalar_lea.hbm %s2112_s5, %s1421_s24 }
 0x4ba   : > { %768 = vadd.xlane.f32.xlu1 %v767_v5 }
 0x4cb   : > { %1115 = vrot.lane.b32.xlu1 %v2011_v32, %s1796_s30  ;;  %s1284_s30 = scalar_lea.sflag [#allocation5], %s1949_s13 }
 0x4fd   : > { %v941_v6 = vpop.xlane.xlu0 %940 }
 0x501   : > { %v774_v7 = vpop.permute.xlu0 %773 }
 0x502   : > { %1509 = vmatpush3.msra.mxu1 %v774_v7 }
 0x503   : > { %1518 = vmatprep.subr.mxu1 %v1792_v0 }
 0x50e   : > { %v1112_v8 = vpop.xlane.xlu1 %1111 }
 0x512   : > { %v945_v9 = vpop.permute.xlu1 %944 }
 0x543   : > { %v769_v10 = vpop.xlane.xlu1 %768 }
 0x544   : > { %1631 = vrcp.f32 %v769_v10 }
 0x545   : > { %1633 = vrcp.f32 %v941_v6 }
 0x546   : > { %1635 = vrcp.f32 %v1112_v8 }
 0x547   : > { %v1116_v16 = vpop.permute.xlu1 %1115 }
 0x551   : > { %v1632_v11 = vpop.eup %1631 }
 0x552   : > { %v771_v12 = vmul.f32 %v1632_v11, %v1630_v4  ;;  %v1634_v13 = vpop.eup %1633 }
 0x553   : > { %v943_v14 = vmul.f32 %v1634_v13, %v1626_v59  ;;  %v1636_v15 = vpop.eup %1635 }
 0x554   : > { %1511 = vmatmul.mubr.msk.f32.vlgmr.msra.gmra.mxu1 %vm521_vm2, %v771_v12  ;;  %v1114_v17 = vmul.f32 %v1636_v15, %v1628_v63 }
 0x555   : > { %1519 = vmatpush3.msra.mxu1 %v945_v9  ;;  %1520 = vmatprep.mubr.msk.f32.mxu1 %vm1793_vm0, %v1792_v0 }
 0x556   : > { %1528 = vmatprep.subr.mxu1 %v1792_v0 }
 0x558   : > { %1521 = vmatmul.mubr.msk.f32.vlgmr.msra.gmra.mxu1 %vm521_vm2, %v943_v14 }
 0x559   : > { %1529 = vmatpush3.msra.mxu1 %v1116_v16  ;;  %1530 = vmatprep.mubr.msk.f32.mxu1 %vm1793_vm0, %v1792_v0 }
 0x55c   : > { %1531 = vmatmul.mubr.msk.f32.vlgmr.msra.gmra.mxu1 %vm521_vm2, %v1114_v17 }
 0x614   : > { %v845_v21 = vpop.f32.mrf.mxu1 }
 0x615   : > { %850 = vrot.lane.b32.xlu0 %v845_v21, %s1797_s28 }
 0x616   : > { %v1512_v23 = vpop.f32.mrf.mxu1 }
 0x618   : > { %v1016_v24 = vpop.f32.mrf.mxu1 }
 0x619   : > { %1021 = vrot.lane.b32.xlu1 %v1016_v24, %s1798_s7 }
 0x61a   : > { %v1522_v25 = vpop.f32.mrf.mxu1 }
 0x61c   : > { %v1187_v26 = vpop.f32.mrf.mxu1 }
 0x61d   : > { %1192 = vrot.lane.b32.xlu0 %v1187_v26, %s1799_s9 }
 0x61e   : > { %v1532_v27 = vpop.f32.mrf.mxu1 }
 0x687   : > { %v851_v28 = vpop.permute.xlu0 %850 }
 0x688   : > { %854 = vst.msk [vmem:[#allocation2] sm:$0xff] %vm853_vm3, %v851_v28 }
 0x68b   : > { %v1022_v29 = vpop.permute.xlu1 %1021 }
 0x68c   : > { %1025 = vst.msk [vmem:[#allocation2] sm:$0xff] %vm1024_vm4, %v1022_v29 }
 0x68f   : > { %v1193_v0 = vpop.permute.xlu0 %1192 }
 0x690   : > { %1196 = vst.msk [vmem:[#allocation2] sm:$0xff] %vm1195_vm5, %v1193_v0 }
 0x697   : > { %v1197_v30 = vld [vmem:[#allocation2] sm:$0xff] }
 0x698   : > { %1542 = vmatmul.mubr.msk.f32.vlgmr.msra.gmra.mxu0 %vm281_vm1, %v1197_v30 }
 0x758   : > { %v1278_v32 = vpop.f32.mrf.mxu0 }
 0x759   : > { %v1279_v33 = vadd.f32 %v1418_v31, %v1278_v32 }
 0x75a   : > { %v1543_v34 = vpop.f32.mrf.mxu0 }
 0x75b   : > { %1282 = vst.msk [vmem:[%s268_s26] sm:$0xff] %vm281_vm1, %v1279_v33 }
 0x75c   : > { %1730 = shalt.err (!%p1727_p9)
}
 0x75d   : > { %s1731_s28 = scalar_lea.hbm %s2069_s12, 128  ;;  %s1735_s9 = scalar_lea.hbm %s2112_s5, 256 }
 0x75e   : > { %p1732_p13 = scmp.ne.s32.totalorder %s2069_s12, %s1731_s28  ;;  %p1736_p4 = scmp.lt.s32.totalorder %s2069_s12, %s2112_s5 }
 0x75f   : > { %p1737_p8 = scmp.lt.s32.totalorder %s1735_s9, %s1731_s28 }
 0x760   : > { %p1733_p5 = pnand %p1732_p13, %p2128_p0 }
 0x761   : > { %p1738_p3 = por %p1737_p8, %p1736_p4 }
 0x762   : > { %p1734_p10 = pneg %p1733_p5 }
 0x764   : > { %p1739_p11 = pnand %p1738_p3, %p1734_p10 }
 0x766   : > { %1742 = shalt.err (!%p1739_p11)
}
 0x767   : > { %1554 = dma.vmem_to_hbm [thread:$0]  (%p2128_p0), %s1298_s8, 128, %s2069_s12, %s1284_s30  }
 0x768 PF: > { %s1309_s24 = sand.u32 1, %s1773_s18   ;;  %p2129_p1 = scmp.ne.s32.totalorder %s2118_s25, 0 }
 0x769   : > { %p2130_p2 = scmp.ge.s32.totalorder %s1785_s21, 2  ;;  %s1310_s26 = scalar_lea.sflag [#allocation5], %s1309_s24 }
 0x76b   : > { %p1568_p6 = pnand %p2130_p2, %p2129_p1 }
 0x76d   : > { %p1569_p12 = pneg %p1568_p6 }
 0x76f   : > { %1768 = dma.done.wait (%p1569_p12), %s1310_s26, 128  }
 0x770   : > { %1770 = vsyncadd (%p1569_p12), %s1310_s26, 4294967168  ;;  %p19_p7 = scmp.ge.s32.totalorder %s1903_s15, 4   ;;  %s2131_s18 = smov %s1777_s19 }
 0x771   : > { %s2132_s19 = smov %s1781_s20  ;;  %s2133_s20 = smov %s1919_s27 }
 0x772   : > { %s2134_s21 = smov %s1903_s15  ;;  %21 = sbr.rel (!%p19_p7) target bundleno = 6 (0x6), region = 97 }
 0x777   :  { %1315 = vsyncpa [#allocation4], 1 }
 0x778   :  { %1317 = vsyncpa [#allocation4 + $0x1], 1 }
 0x779   :  { %1318 = vsyncpa [#allocation7], 1 }
 0x77a   :  { %1319 = vsyncpa [#allocation5], 1 }
 0x77b   :  { %1321 = vsyncpa [#allocation5 + $0x1], 1 }

</bundles_post_ra>
